<compile_context>
chip_gen: v7x
topology: tpu7x:2x2x1
jax: 0.10.0
libtpu: 0.0.40
codegen_flags: <defaults>
</compile_context>

<pallas_src>
import numpy as np
import jax
import jax.numpy as jnp
from jax import lax
from jax.experimental import pallas as pl
from jax.experimental.pallas import tpu as pltpu


# ----------------------------------------------------------------------------
# Kernels
# ----------------------------------------------------------------------------
def conv_stats_kernel(p_ref, w_ref, y_ref, psum_ref, psumsq_ref):
    """Conv-as-matmul + fused BN partial statistics.

    p_ref:     (tm, Kp)  bf16   patch rows for this tile
    w_ref:     (Kp, Cp)  bf16   full weight matrix (VMEM-resident, same block
                                every grid step -> DMA'd once)
    y_ref:     (tm, Cp)  f32    conv output tile
    psum_ref:  (1, 8, Cp) f32   per-tile partial channel sums   (8 sublanes)
    psumsq_ref:(1, 8, Cp) f32   per-tile partial channel sum-of-squares
    """
    acc = jnp.dot(p_ref[...], w_ref[...], preferred_element_type=jnp.float32)
    y_ref[...] = acc

    tm, cp = y_ref.shape
    # Partial-reduce the row axis down to 8 sublanes so the stats stores stay
    # full-sublane (no masked single-row vst); final reduction is done in the
    # wrapper on a (num_tiles, 8, Cp) array -> negligible traffic.
    a = acc.reshape(tm // 8, 8, cp)
    psum_ref[...] = jnp.sum(a, axis=0)[None]
    psumsq_ref[...] = jnp.sum(a * a, axis=0)[None]


def bn_relu_drop_kernel(y_ref, scale_ref, shift_ref, o_ref):
    """z = max(y * scale + shift, 0). Dropout3d is pre-folded into scale/shift."""
    z = y_ref[...] * scale_ref[0] + shift_ref[0]
    o_ref[...] = jnp.maximum(z, 0.0).astype(o_ref.dtype)


# ----------------------------------------------------------------------------
# Pallas wrappers
# ----------------------------------------------------------------------------
def conv_with_stats(P, Wm, *, tm):
    """Y[M,Cp] = P @ Wm plus per-row-tile partial BN sums / sums-of-squares."""
    M, Kp = P.shape
    _, Cp = Wm.shape
    nt = M // tm
    return pl.pallas_call(
        conv_stats_kernel,
        out_shape=(jax.ShapeDtypeStruct((M, Cp), jnp.float32),
                   jax.ShapeDtypeStruct((nt, 8, Cp), jnp.float32),
                   jax.ShapeDtypeStruct((nt, 8, Cp), jnp.float32)),
        grid_spec=pltpu.PrefetchScalarGridSpec(
            num_scalar_prefetch=0,
            grid=(nt,),
            in_specs=[
                pl.BlockSpec((tm, Kp), lambda i: (i, 0)),
                # Same block index every step -> weight stays VMEM-resident.
                pl.BlockSpec((Kp, Cp), lambda i: (0, 0)),
            ],
            out_specs=[
                pl.BlockSpec((tm, Cp), lambda i: (i, 0)),
                pl.BlockSpec((1, 8, Cp), lambda i: (i, 0, 0)),
                pl.BlockSpec((1, 8, Cp), lambda i: (i, 0, 0)),
            ],
        ),
        compiler_params=pltpu.CompilerParams(
            dimension_semantics=("parallel",)),
    )(P, Wm)


def bn_relu_dropout(Y, scale2, shift2, *, rows_per_sample, tm):
    """Elementwise BN-normalize + ReLU + (folded) Dropout3d over row tiles."""
    M, Cp = Y.shape
    N = scale2.shape[0]
    tiles_per_sample = rows_per_sample // tm
    scale3 = scale2.reshape(N, 1, Cp)
    shift3 = shift2.reshape(N, 1, Cp)
    return pl.pallas_call(
        bn_relu_drop_kernel,
        out_shape=jax.ShapeDtypeStruct((M, Cp), jnp.float32),
        grid_spec=pltpu.PrefetchScalarGridSpec(
            num_scalar_prefetch=0,
            grid=(N, tiles_per_sample),
            in_specs=[
                pl.BlockSpec((tm, Cp),
                             lambda n, j: (n * tiles_per_sample + j, 0)),
                pl.BlockSpec((1, 1, Cp), lambda n, j: (n, 0, 0)),
                pl.BlockSpec((1, 1, Cp), lambda n, j: (n, 0, 0)),
            ],
            out_specs=pl.BlockSpec((tm, Cp),
                                   lambda n, j: (n * tiles_per_sample + j, 0)),
        ),
        compiler_params=pltpu.CompilerParams(
            dimension_semantics=("parallel", "parallel")),
    )(Y, scale3, shift3)


# ----------------------------------------------------------------------------
# Glue: im2col, parameter packing, full forward
# ----------------------------------------------------------------------------
def _triple(v):
    return (v, v, v) if isinstance(v, int) else tuple(v)


def _round_up(a, b):
    return pl.cdiv(a, b) * b


def _pick_tile(total, pref=512):
    """Largest tile <= pref that divides `total` and is a multiple of 8."""
    assert total % 8 == 0, total
    t = min(pref, total)
    while t > 8 and (total % t != 0 or t % 8 != 0):
        t -= 8
    assert total % t == 0 and t % 8 == 0
    return t


def im2col_3d(x, ksize, stride, padding, dilation):
    """x: (N, Cin, D, H, W) -> P: (N*Do*Ho*Wo, Cin*kD*kH*kW), K ordered (ci,kd,kh,kw)."""
    N, Cin, D, H, W = x.shape
    kD, kH, kW = ksize
    sD, sH, sW = stride
    pD, pH, pW = padding
    dD, dH, dW = dilation
    Do = (D + 2 * pD - dD * (kD - 1) - 1) // sD + 1
    Ho = (H + 2 * pH - dH * (kH - 1) - 1) // sH + 1
    Wo = (W + 2 * pW - dW * (kW - 1) - 1) // sW + 1
    xp = jnp.pad(x, ((0, 0), (0, 0), (pD, pD), (pH, pH), (pW, pW)))
    taps = []
    for kd in range(kD):
        for kh in range(kH):
            for kw in range(kW):
                sl = xp[:, :,
                        kd * dD: kd * dD + sD * (Do - 1) + 1: sD,
                        kh * dH: kh * dH + sH * (Ho - 1) + 1: sH,
                        kw * dW: kw * dW + sW * (Wo - 1) + 1: sW]
                taps.append(sl)                       # (N, Cin, Do, Ho, Wo)
    t = jnp.stack(taps, axis=0)                       # (T, N, Cin, Do, Ho, Wo)
    t = jnp.transpose(t, (1, 3, 4, 5, 2, 0))          # (N, Do, Ho, Wo, Cin, T)
    P = t.reshape(N * Do * Ho * Wo, Cin * kD * kH * kW)
    return P, (Do, Ho, Wo)


def batchnorm_relu_dropout3d(x, weight, gamma, beta, drop_mask, *,
                             stride=1, padding=0, dilation=1, eps=1e-5):
    """Training-mode forward of the PyTorch module. x: NCDHW, returns NCDHW."""
    stride, padding, dilation = _triple(stride), _triple(padding), _triple(dilation)
    N, Cin, D, H, W = x.shape
    Cout, _, kD, kH, kW = weight.shape

    # im2col in bf16 (halves the XLA-side patch traffic and feeds the MXU's
    # native bf16 path; accumulation stays f32 inside the kernel).
    x16 = x.astype(jnp.bfloat16)
    P, (Do, Ho, Wo) = im2col_3d(x16, (kD, kH, kW), stride, padding, dilation)
    M, K = P.shape
    rows_per_sample = Do * Ho * Wo

    Kp = max(128, _round_up(K, 128))
    Cp = max(128, _round_up(Cout, 128))
    tm_mm = _pick_tile(M, pref=512)               # matmul row tile
    tm_ew = _pick_tile(rows_per_sample, pref=512)  # elementwise row tile

    # Pad only the lane (K) dim in bf16 — cheap relative to P itself.
    Ppad = jnp.pad(P, ((0, 0), (0, Kp - K)))
    Wm = weight.reshape(Cout, Cin * kD * kH * kW).T.astype(jnp.bfloat16)
    Wm = jnp.pad(Wm, ((0, Kp - K), (0, Cp - Cout)))          # (Kp, Cp)

    # --- conv as matmul + fused BN partial statistics (single Pallas pass) ---
    Y, psum, psumsq = conv_with_stats(Ppad, Wm, tm=tm_mm)    # (M,Cp),(nt,8,Cp)x2

    ch_sum = jnp.sum(psum, axis=(0, 1))                      # (Cp,) f32
    ch_sumsq = jnp.sum(psumsq, axis=(0, 1))
    mean = ch_sum / float(M)
    var = jnp.maximum(ch_sumsq / float(M) - mean * mean, 0.0)  # biased (PyTorch BN)

    gamma_p = jnp.pad(gamma, (0, Cp - Cout))
    beta_p = jnp.pad(beta, (0, Cp - Cout))
    scale = gamma_p * lax.rsqrt(var + eps)                   # (Cp,)
    shift = beta_p - mean * scale

    # Fold Dropout3d (per sample, per channel, includes 1/(1-p)) into BN affine:
    # relu(y*s + b) * d == relu(y*(s*d) + (b*d)) because d >= 0.
    drop_p = jnp.pad(drop_mask, ((0, 0), (0, Cp - Cout)))    # (N, Cp)
    scale2 = scale[None, :] * drop_p
    shift2 = shift[None, :] * drop_p

    # --- BN normalize + ReLU + Dropout3d (single elementwise Pallas pass) ---
    Z = bn_relu_dropout(Y, scale2, shift2,
                        rows_per_sample=rows_per_sample, tm=tm_ew)

    out = Z[:, :Cout].reshape(N, Do, Ho, Wo, Cout)
    return jnp.transpose(out, (0, 4, 1, 2, 3))               # NCDHW


# ----------------------------------------------------------------------------
# Reference (plain JAX, f32) for a sanity check
# ----------------------------------------------------------------------------
def reference(x, weight, gamma, beta, drop_mask, *, stride, padding, dilation, eps=1e-5):
    stride, padding, dilation = _triple(stride), _triple(padding), _triple(dilation)
    y = lax.conv_general_dilated(
        x, weight, window_strides=stride,
        padding=[(p, p) for p in padding], rhs_dilation=dilation,
        dimension_numbers=("NCDHW", "OIDHW", "NCDHW"),
        precision=lax.Precision.HIGHEST)
    mean = jnp.mean(y, axis=(0, 2, 3, 4), keepdims=True)
    var = jnp.mean((y - mean) ** 2, axis=(0, 2, 3, 4), keepdims=True)
    z = (y - mean) / jnp.sqrt(var + eps)
    z = z * gamma.reshape(1, -1, 1, 1, 1) + beta.reshape(1, -1, 1, 1, 1)
    z = jnp.maximum(z, 0.0)
    return z * drop_mask[:, :, None, None, None]


# ----------------------------------------------------------------------------
if __name__ == "__main__":
    # Module config (small): in_channels=4, out_channels=8, kernel_size=3,
    # stride=1, padding=1, dilation=1, dropout_rate=0.5, bias=False
    N, Cin, Cout = 2, 4, 8
    D = H = W = 8
    ksz, stride, padding, dilation, drop_rate = 3, 1, 1, 1, 0.5

    key = jax.random.PRNGKey(0)
    kx, kw, kd = jax.random.split(key, 3)

    x = jax.random.normal(kx, (N, Cin, D, H, W), jnp.float32)

    # Deterministic parameter init (mimics PyTorch kaiming-uniform bound).
    fan_in = Cin * ksz * ksz * ksz
    bound = 1.0 / np.sqrt(fan_in)
    weight = jax.random.uniform(kw, (Cout, Cin, ksz, ksz, ksz), jnp.float32,
                                -bound, bound)
    gamma = jnp.ones((Cout,), jnp.float32)   # BatchNorm3d affine init
    beta = jnp.zeros((Cout,), jnp.float32)

    # Dropout3d mask: per (sample, channel), keep with prob 1-p, scale by 1/(1-p).
    # TODO(synk): cannot bit-match torch's RNG stream; mask is generated
    # deterministically here and shared by kernel + reference.
    keep = (jax.random.uniform(kd, (N, Cout)) >= drop_rate).astype(jnp.float32)
    drop_mask = keep / (1.0 - drop_rate)

    out = batchnorm_relu_dropout3d(
        x, weight, gamma, beta, drop_mask,
        stride=stride, padding=padding, dilation=dilation)
    out = jax.block_until_ready(out)

    ref = jax.block_until_ready(
        reference(x, weight, gamma, beta, drop_mask,
                  stride=stride, padding=padding, dilation=dilation))

    assert out.shape == (N, Cout, D, H, W), out.shape
    # Tolerance 2e-2: conv inputs are cast to bf16 for the MXU (f32 reference);
    # after BN normalization + 2x dropout rescale the worst-case bf16-input
    # rounding error is ~1e-2 absolute.
    np.testing.assert_allclose(np.asarray(out), np.asarray(ref),
                               rtol=2e-2, atol=2e-2)
    print("KERNEL_OK")
</pallas_src>

<mosaic_0001>
module attributes {stable_mosaic.version = 11 : i64} {
  func.func @conv_stats_kernel(%arg0: i32, %arg1: memref<512x128xbf16, #tpu.memory_space<vmem>>, %arg2: memref<128x128xbf16, #tpu.memory_space<vmem>>, %arg3: memref<512x128xf32, #tpu.memory_space<vmem>>, %arg4: memref<1x8x128xf32, #tpu.memory_space<vmem>>, %arg5: memref<1x8x128xf32, #tpu.memory_space<vmem>>) attributes {dimension_semantics = [#tpu.dimension_semantics<parallel>], iteration_bounds = array<i64: 2>, scalar_prefetch = 0 : i64, scratch_operands = 0 : i64, tpu.core_type = #tpu.core_type<tc>, window_params = [{transform_indices = @transform_0, window_bounds = array<i64: 512, 128>}, {pipeline_mode = #tpu.pipeline_mode<synchronous>, transform_indices = @transform_1, window_bounds = array<i64: 128, 128>}, {transform_indices = @transform_2, window_bounds = array<i64: 512, 128>}, {transform_indices = @transform_3, window_bounds = array<i64: 1, 8, 128>}, {transform_indices = @transform_4, window_bounds = array<i64: 1, 8, 128>}]} {
    %c0 = arith.constant 0 : index
    %c0_0 = arith.constant 0 : index
    %0 = vector.load %arg1[%c0, %c0_0] : memref<512x128xbf16, #tpu.memory_space<vmem>>, vector<512x128xbf16>
    %c0_1 = arith.constant 0 : index
    %c0_2 = arith.constant 0 : index
    %1 = vector.load %arg2[%c0_1, %c0_2] : memref<128x128xbf16, #tpu.memory_space<vmem>>, vector<128x128xbf16>
    %cst = arith.constant dense<0.000000e+00> : vector<512x128xf32>
    %2 = tpu.matmul %0, %1, %cst {dimension_numbers = #tpu.dot_dimension_numbers<[1], [0], [0], [1], [0, 0, 1, 1], [], []>} : vector<512x128xbf16>, vector<128x128xbf16>, vector<512x128xf32> -> vector<512x128xf32>
    %c0_3 = arith.constant 0 : index
    %c0_4 = arith.constant 0 : index
    %3 = vector.load %arg3[%c0_3, %c0_4] : memref<512x128xf32, #tpu.memory_space<vmem>>, vector<512x128xf32>
    tpu.vector_store %arg3[%c0_3, %c0_4], %2 {strides = array<i32>} : memref<512x128xf32, #tpu.memory_space<vmem>>, vector<512x128xf32>,
    %4 = vector.shape_cast %2 : vector<512x128xf32> to vector<64x8x128xf32>
    %cst_5 = arith.constant dense<0.000000e+00> : vector<8x128xf32>
    %5 = vector.multi_reduction <add>, %4, %cst_5 [0] : vector<64x8x128xf32> to vector<8x128xf32>
    %6 = vector.shape_cast %5 : vector<8x128xf32> to vector<1x8x128xf32>
    %c0_6 = arith.constant 0 : index
    %c0_7 = arith.constant 0 : index
    %c0_8 = arith.constant 0 : index
    %7 = vector.load %arg4[%c0_6, %c0_7, %c0_8] : memref<1x8x128xf32, #tpu.memory_space<vmem>>, vector<1x8x128xf32>
    tpu.vector_store %arg4[%c0_6, %c0_7, %c0_8], %6 {strides = array<i32>} : memref<1x8x128xf32, #tpu.memory_space<vmem>>, vector<1x8x128xf32>,
    %8 = arith.mulf %4, %4 : vector<64x8x128xf32>
    %cst_9 = arith.constant dense<0.000000e+00> : vector<8x128xf32>
    %9 = vector.multi_reduction <add>, %8, %cst_9 [0] : vector<64x8x128xf32> to vector<8x128xf32>
    %10 = vector.shape_cast %9 : vector<8x128xf32> to vector<1x8x128xf32>
    %c0_10 = arith.constant 0 : index
    %c0_11 = arith.constant 0 : index
    %c0_12 = arith.constant 0 : index
    %11 = vector.load %arg5[%c0_10, %c0_11, %c0_12] : memref<1x8x128xf32, #tpu.memory_space<vmem>>, vector<1x8x128xf32>
    tpu.vector_store %arg5[%c0_10, %c0_11, %c0_12], %10 {strides = array<i32>} : memref<1x8x128xf32, #tpu.memory_space<vmem>>, vector<1x8x128xf32>,
    return
  }
  func.func @transform_0(%arg0: i32) -> (i32, i32) {
    %c0_i32 = arith.constant 0 : i32
    %c0_i32_0 = arith.constant 0 : i32
    return %arg0, %c0_i32 : i32, i32
  }
  func.func @transform_1(%arg0: i32) -> (i32, i32) {
    %c0_i32 = arith.constant 0 : i32
    %c0_i32_0 = arith.constant 0 : i32
    %c0_i32_1 = arith.constant 0 : i32
    return %c0_i32, %c0_i32_0 : i32, i32
  }
  func.func @transform_2(%arg0: i32) -> (i32, i32) {
    %c0_i32 = arith.constant 0 : i32
    %c0_i32_0 = arith.constant 0 : i32
    return %arg0, %c0_i32 : i32, i32
  }
  func.func @transform_3(%arg0: i32) -> (i32, i32, i32) {
    %c0_i32 = arith.constant 0 : i32
    %c0_i32_0 = arith.constant 0 : i32
    %c0_i32_1 = arith.constant 0 : i32
    return %arg0, %c0_i32, %c0_i32_0 : i32, i32, i32
  }
  func.func @transform_4(%arg0: i32) -> (i32, i32, i32) {
    %c0_i32 = arith.constant 0 : i32
    %c0_i32_0 = arith.constant 0 : i32
    %c0_i32_1 = arith.constant 0 : i32
    return %arg0, %c0_i32, %c0_i32_0 : i32, i32, i32
  }
}

</mosaic_0001>

<bundles_post_ra>
// kernel: tpu_custom_call.1
= control target key start
LH: loop header
LB: loop body
LE: loop exit
PB: predicated region body
PF: predicated region fallthrough
CT: control target
= control target key end

     0   :  { %10 = vsyncpa [#allocation3], 0  ;;  %s2418_s0 = inlined_call_operand.hbm [shape: bf16[1024,128], index: 0, kind: input, shape index: {}]   ;;  %s2419_s1 = inlined_call_operand.hbm [shape: bf16[128,128], index: 1, kind: input, shape index: {}]   ;;  %s2420_s2 = inlined_call_operand.hbm [shape: f32[1024,128], index: 2, kind: output, shape index: {0}]   ;;  %s2421_s3 = inlined_call_operand.hbm [shape: f32[2,8,128], index: 3, kind: output, shape index: {1}]   ;;  %s2422_s4 = inlined_call_operand.hbm [shape: f32[2,8,128], index: 4, kind: output, shape index: {2}]  }
   0x1   :  { %12 = vsyncpa [#allocation3 + $0x1], 0 }
   0x2   :  { %13 = vsyncpa [#allocation6], 0 }
   0x3   :  { %14 = vsyncpa [#allocation4], 0 }
   0x4   :  { %16 = vsyncpa [#allocation4 + $0x1], 0 }
   0x5   :  { %17 = vsyncpa [#allocation9], 0 }
   0x6   :  { %19 = vsyncpa [#allocation9 + $0x1], 0  ;;  %s1846_s15 = smov 0   ;;  %s1848_s16 = smov 0  }
   0x7   :  { %s1850_s17 = smov 0   ;;  %s1852_s18 = smov 0  }
   0x8 LB: > { %s1867_s19 = sadd.s32 4294967295, %s1810_s18   ;;  %s1311_s20 = sadd.s32 4294967294, %s1810_s18   ;;  %s1810_s18 = sphi %s1852_s18, %s2442_s18   ;;  %s1806_s17 = sphi %s1850_s17, %s2441_s17   ;;  %s1802_s16 = sphi %s1848_s16, %s2440_s16   ;;  %s1798_s15 = sphi %s1846_s15, %s2439_s15  }
   0x9   : > { %p45_p0 = scmp.ne.s32.totalorder %s1802_s16, %s1798_s15  ;;  %p2423_p1 = scmp.eq.s32.totalorder %s1867_s19, 0 }
   0xa   : > { %p96_p3 = scmp.eq.s32.totalorder %s1311_s20, 1  ;;  %p1312_p5 = scmp.ge.s32.totalorder %s1810_s18, 1 }
   0xb   : > { %p1878_p4 = por %p2423_p1, %p45_p0  ;;  %p155_p7 = scmp.lt.s32.totalorder %s1810_s18, 3 }
   0xc   : > { %p1883_p6 = por %p96_p3, %p45_p0  ;;  %s1812_s24 = smov [#allocation5]  }
   0xd   : > { %s2426_s21 = scalar_select %p1878_p4, 1, 0 }
   0xe   : > { %s2427_s22 = scalar_select %p1883_p6, 1, 0 }
   0xf   : > { %p1888_p8 = pnand %p1312_p5, %p155_p7  ;;  %s167_s25 = sshll.u32 %s1812_s24, 4  ;;  %s1892_s25 = int_to_ptr.vmem [resolvable:$true] %s167_s25 }
  0x10   : > { %s1904_s27 = sadd.s32 1, %s1810_s18   ;;  %s32_s28 = sadd.s32 1, %s1806_s17 }
  0x11   : > { %s2428_s23 = scalar_select %p1888_p8, 1, 0 }
  0x12   : > { %p1523_p9 = pneg %p1888_p8  ;;  %s29_s29 = ssub.s32 %s1810_s18, %s1904_s27 }
  0x13   : > { %s1622_s6 = scalar_lea.hbm %s2419_s1, 1024 }
  0x14   : > { %p1899_p11 = pnand %p1523_p9, %p2423_p1  ;;  %p1623_p12 = scmp.ne.s32.totalorder %s2419_s1, %s1622_s6 }
  0x15   : > { %p1629_p5 = scmp.lt.u32.totalorder %s1622_s6, %s2419_s1 }
  0x16   : > { %p1624_p13 = pneg %p1899_p11 }
  0x18   : > { %p1625_p0 = pnand %p1624_p13, %p1623_p12 }
  0x1a   : > { %p1626_p3 = pneg %p1625_p0 }
  0x1c   : > { %p1631_p7 = pnand %p1629_p5, %p1626_p3 }
  0x1e   : > { %1634 = shalt.err (!%p1631_p7)
}
  0x1f   : > { %s1635_s11 = scalar_lea.vmem %s1892_s25, 1024  ;;  %p1643_p2 = scmp.lt.s32.totalorder %s1892_s25, %s1892_s25 }
  0x20   : > { %p1636_p9 = scmp.ne.s32.totalorder %s1892_s25, %s1635_s11  ;;  %p1644_p6 = scmp.lt.s32.totalorder %s1635_s11, %s1635_s11 }
  0x22   : > { %p1638_p10 = pnand %p1636_p9, %p1624_p13  ;;  %p1645_p4 = por %p1644_p6, %p1643_p2 }
  0x24   : > { %p1639_p1 = pneg %p1638_p10 }
  0x26   : > { %p1646_p8 = pnand %p1645_p4, %p1639_p1 }
  0x28   : > { %1649 = shalt.err (!%p1646_p8)
}
  0x29   : > { %s1813_s12 = smov 64   ;;  %s1814_s13 = smov 4  }
  0x2a   : > { %1526 = dma.hbm_to_vmem [thread:$0]  (!%p1899_p11), %s2419_s1, 1024, %s1892_s25, [#allocation6], %s1813_s12, %s1813_s12, %s1814_s13  }
  0x2b   : > { %p30_p1 = scmp.eq.s32.totalorder %s29_s29, 0  ;;  %p39_p2 = scmp.ne.s32.totalorder %s1806_s17, %s1802_s16 }
  0x2c   : > { %p40_p4 = scmp.eq.s32.totalorder %s1810_s18, 0  ;;  %p1542_p6 = scmp.lt.s32.totalorder %s1810_s18, 2 }
  0x2d   : > { %s1938_s30 = scalar_select %p30_p1, %s1806_s17, %s32_s28  }
  0x2e   : > { %p41_p8 = por %p40_p4, %p39_p2  ;;  %p2430_p10 = scmp.eq.s32.totalorder %s1867_s19, 1 }
  0x2f   : > { %s181_s26 = sand.u32 1, %s1806_s17   ;;  %s1373_s6 = sshll.u32 %s1810_s18, 12 }
  0x30   : > { %p1942_p12 = por %p2430_p10, %p39_p2  ;;  %s1315_s7 = sshll.u32 %s181_s26, 8 }
  0x31   : > { %s1951_s10 = scalar_lea.hbm %s2418_s0, %s1373_s6  ;;  %s185_s25 = scalar_lea.vmem [#allocation2], %s1315_s7 }
  0x32   : > { %s192_s28 = sshll.u32 %s185_s25, 4  ;;  %p1953_p11 = pnand %p1542_p6, %p41_p8  ;;  %s1957_s28 = int_to_ptr.vmem [resolvable:$true] %s192_s28 }
  0x33   : > { %s1959_s11 = scalar_lea.sflag [#allocation3], %s181_s26  ;;  %s1650_s14 = scalar_lea.hbm %s1951_s10, 4096 }
  0x34   : > { %p1651_p13 = scmp.ne.s32.totalorder %s1951_s10, %s1650_s14  ;;  %p1652_p0 = pneg %p1953_p11 }
  0x35   : > { %s1655_s7 = scalar_lea.hbm %s2418_s0, 8192  ;;  %p1656_p7 = scmp.lt.u32.totalorder %s1951_s10, %s2418_s0 }
  0x36   : > { %p1653_p3 = pnand %p1652_p0, %p1651_p13  ;;  %p1657_p9 = scmp.lt.u32.totalorder %s1655_s7, %s1650_s14 }
  0x37   : > { %p1659_p2 = scmp.lt.u32.totalorder %s1650_s14, %s1951_s10 }
  0x38   : > { %p1654_p5 = pneg %p1653_p3  ;;  %p1658_p1 = por %p1657_p9, %p1656_p7 }
  0x3a   : > { %p1660_p4 = por %p1659_p2, %p1658_p1 }
  0x3c   : > { %p1661_p6 = pnand %p1660_p4, %p1654_p5 }
  0x3e   : > { %1664 = shalt.err (!%p1661_p6)
}
  0x3f   : > { %s1665_s26 = scalar_lea.vmem %s1957_s28, 4096  ;;  %s1815_s25 = smov [#allocation2]  }
  0x40   : > { %p1666_p8 = scmp.ne.s32.totalorder %s1957_s28, %s1665_s26  ;;  %s1670_s24 = sshll.u32 %s1815_s25, 4  ;;  %s1671_s24 = int_to_ptr.vmem [resolvable:$false] %s1670_s24 }
  0x41   : > { %s1672_s6 = scalar_lea.vmem %s1671_s24, 8192  ;;  %p1673_p3 = scmp.lt.s32.totalorder %s1957_s28, %s1671_s24 }
  0x42   : > { %p1668_p10 = pnand %p1666_p8, %p1652_p0  ;;  %p1674_p7 = scmp.lt.s32.totalorder %s1672_s6, %s1665_s26 }
  0x44   : > { %p1669_p13 = pneg %p1668_p10  ;;  %p1675_p9 = por %p1674_p7, %p1673_p3 }
  0x46   : > { %p1676_p1 = pnand %p1675_p9, %p1669_p13 }
  0x48   : > { %1679 = shalt.err (!%p1676_p1)
}
  0x49   : > { %1530 = dma.hbm_to_vmem [thread:$0]  (!%p1953_p11), %s1951_s10, 4096, %s1957_s28, %s1959_s11, %s1813_s12, %s1813_s12, %s1814_s13  }
  0x4a   : > { %p2433_p0 = scmp.ne.s32.totalorder %s2428_s23, 0 }
  0x4b   : > { %s1993_s14 = sand.u32 (!%p2433_p0), 1, %s1802_s16   ;;  %p2434_p5 = scmp.ne.s32.totalorder (!%p2433_p0), %s2426_s21, 0 }
  0x4c   : > { %204 = sbr.rel (%p2433_p0) target bundleno = 508 (0x1fc), region = 28  ;;  %s1319_s7 = sshll.u32 (!%p2433_p0), %s1993_s14, 8 }
  0x4d   : > { %s207_s8 = scalar_lea.sflag (!%p2433_p0), [#allocation3], %s1993_s14  ;;  %s1997_s9 = scalar_lea.vmem (!%p2433_p0), [#allocation2], %s1319_s7 }
  0x53   : > { %1781 = dma.done.wait (%p2434_p5), %s207_s8, 4096  }
  0x54   : > { %1783 = vsyncadd (%p2434_p5), %s207_s8, 4294963200  ;;  %p2435_p11 = scmp.eq.s32.totalorder %s1867_s19, 0 }
  0x56   : > { %1785 = dma.done.wait (%p2435_p11), [#allocation6], 1024   ;;  %p2436_p2 = pmov %p2435_p11 }
  0x57   : > { %v1582_v0 = vld [vmem:[#allocation5] sm:$0xff]   ;;  %v1583_v1 = vld [vmem:[#allocation5 + $0x8] sm:$0xff]   ;;  %v1584_v2 = vld [vmem:[#allocation5 + $0x10] sm:$0xff]   ;;  %s1321_s21 = sshll.u32 %s1993_s14, 9  ;;  %s1374_s12 = sshll.u32 %s1867_s19, 13 }
  0x58   : > { %1787 = vsyncadd (%p2436_p2), [#allocation6], 4294966272  ;;  %1415 = vmatprep.subr.bf16.mxu0 %v1582_v0  ;;  %1495 = vmatprep.subr.bf16.mxu1 %v1582_v0  ;;  %v1585_v3 = vld [vmem:[#allocation5 + $0x18] sm:$0xff]   ;;  %v1590_v4 = vld [vmem:[%s1997_s9] sm:$0xff]   ;;  %s2042_s23 = scalar_lea.vmem [#allocation7], %s1321_s21  ;;  %s2194_s29 = scalar_lea.hbm %s2420_s2, %s1374_s12 }
  0x59   : > { %1416 = vmatpush3.bf16.msra.mxu0 %v1582_v0  ;;  %1503 = vmatpush3.bf16.msra.mxu1 %v1582_v0  ;;  %v1586_v5 = vld [vmem:[#allocation5 + $0x20] sm:$0xff]   ;;  %v1587_v6 = vld [vmem:[#allocation5 + $0x28] sm:$0xff]   ;;  %v1588_v7 = vld [vmem:[#allocation5 + $0x30] sm:$0xff]   ;;  %s1141_s13 = sshll.u32 %s2042_s23, 4  ;;  %s1118_s11 = scalar_lea.sflag [#allocation4], %s1993_s14  ;;  %s2196_s13 = int_to_ptr.vmem [resolvable:$true] %s1141_s13 }
  0x5a   : > { %1417 = vmatprep.subr.bf16.mxu0 %v1583_v1  ;;  %1496 = vmatprep.subr.bf16.mxu1 %v1583_v1  ;;  %v1589_v8 = vld [vmem:[#allocation5 + $0x38] sm:$0xff]   ;;  %v1606_v9 = vld [vmem:[%s1997_s9 + $0x80] sm:$0xff]   ;;  %v1591_v10 = vld [vmem:[%s1997_s9 + $0x8] sm:$0xff]   ;;  %s1680_s26 = scalar_lea.vmem %s2196_s13, 8192  ;;  %s1816_s25 = smov [#allocation7]  }
  0x5b   : > { %1431 = vmatprep.mubr.bf16.mxu0 %v1590_v4  ;;  %1463 = vmatprep.mubr.bf16.mxu1 %v1606_v9  ;;  %v1592_v11 = vld [vmem:[%s1997_s9 + $0x10] sm:$0xff]   ;;  %v1607_v12 = vld [vmem:[%s1997_s9 + $0x88] sm:$0xff]   ;;  %v1593_v14 = vld [vmem:[%s1997_s9 + $0x18] sm:$0xff]   ;;  %p1681_p4 = scmp.ne.s32.totalorder %s2196_s13, %s1680_s26  ;;  %s1684_s24 = sshll.u32 %s1816_s25, 4  ;;  %s1685_s24 = int_to_ptr.vmem [resolvable:$false] %s1684_s24 }
  0x5c   : > { %v1608_v13 = vld [vmem:[%s1997_s9 + $0x90] sm:$0xff]   ;;  %v1594_v15 = vld [vmem:[%s1997_s9 + $0x20] sm:$0xff]   ;;  %v1609_v16 = vld [vmem:[%s1997_s9 + $0x98] sm:$0xff]   ;;  %s1686_s6 = scalar_lea.vmem %s1685_s24, 16384  ;;  %p1687_p10 = scmp.lt.s32.totalorder %s2196_s13, %s1685_s24 }
  0x5d   : > { %1418 = vmatpush3.bf16.msra.mxu0 %v1583_v1  ;;  %1504 = vmatpush3.bf16.msra.mxu1 %v1583_v1  ;;  %v1610_v17 = vld [vmem:[%s1997_s9 + $0xa0] sm:$0xff]   ;;  %v1595_v18 = vld [vmem:[%s1997_s9 + $0x28] sm:$0xff]   ;;  %v1596_v20 = vld [vmem:[%s1997_s9 + $0x30] sm:$0xff]   ;;  %p1682_p6 = pnand %p1681_p4, %p1942_p12  ;;  %p1688_p13 = scmp.lt.s32.totalorder %s1686_s6, %s1680_s26 }
  0x5e   : > { %1419 = vmatprep.subr.bf16.mxu0 %v1584_v2  ;;  %1497 = vmatprep.subr.bf16.mxu1 %v1584_v2  ;;  %v1611_v19 = vld [vmem:[%s1997_s9 + $0xa8] sm:$0xff]   ;;  %v1612_v21 = vld [vmem:[%s1997_s9 + $0xb0] sm:$0xff]   ;;  %v1597_v22 = vld [vmem:[%s1997_s9 + $0x38] sm:$0xff]  }
  0x5f   : > { %v1613_v23 = vld [vmem:[%s1997_s9 + $0xb8] sm:$0xff]   ;;  %v1598_v24 = vld [vmem:[%s1997_s9 + $0x40] sm:$0xff]   ;;  %v1599_v26 = vld [vmem:[%s1997_s9 + $0x48] sm:$0xff]   ;;  %p1683_p8 = pneg %p1682_p6  ;;  %p1689_p3 = por %p1688_p13, %p1687_p10 }
  0x60   : > { %v1614_v25 = vld [vmem:[%s1997_s9 + $0xc0] sm:$0xff]   ;;  %v1615_v27 = vld [vmem:[%s1997_s9 + $0xc8] sm:$0xff]   ;;  %v1600_v28 = vld [vmem:[%s1997_s9 + $0x50] sm:$0xff]  }
  0x61   : > { %1420 = vmatpush3.bf16.msra.mxu0 %v1584_v2  ;;  %1505 = vmatpush3.bf16.msra.mxu1 %v1584_v2  ;;  %v1616_v29 = vld [vmem:[%s1997_s9 + $0xd0] sm:$0xff]   ;;  %v1601_v30 = vld [vmem:[%s1997_s9 + $0x58] sm:$0xff]   ;;  %v1602_v32 = vld [vmem:[%s1997_s9 + $0x60] sm:$0xff]   ;;  %p1690_p7 = pnand %p1689_p3, %p1683_p8 }
  0x62   : > { %1421 = vmatprep.subr.bf16.mxu0 %v1585_v3  ;;  %1498 = vmatprep.subr.bf16.mxu1 %v1585_v3  ;;  %v1617_v31 = vld [vmem:[%s1997_s9 + $0xd8] sm:$0xff]   ;;  %v1618_v33 = vld [vmem:[%s1997_s9 + $0xe0] sm:$0xff]   ;;  %v1603_v34 = vld [vmem:[%s1997_s9 + $0x68] sm:$0xff]  }
  0x63   : > { %v1619_v35 = vld [vmem:[%s1997_s9 + $0xe8] sm:$0xff]   ;;  %v1604_v36 = vld [vmem:[%s1997_s9 + $0x70] sm:$0xff]   ;;  %v1605_v38 = vld [vmem:[%s1997_s9 + $0x78] sm:$0xff]  }
  0x64   : > { %v1620_v37 = vld [vmem:[%s1997_s9 + $0xf0] sm:$0xff]   ;;  %v1621_v39 = vld [vmem:[%s1997_s9 + $0xf8] sm:$0xff]  }
  0x65   : > { %1422 = vmatpush3.bf16.msra.mxu0 %v1585_v3  ;;  %1506 = vmatpush3.bf16.msra.mxu1 %v1585_v3 }
  0x66   : > { %1423 = vmatprep.subr.bf16.mxu0 %v1586_v5  ;;  %1499 = vmatprep.subr.bf16.mxu1 %v1586_v5 }
  0x69   : > { %1424 = vmatpush3.bf16.msra.mxu0 %v1586_v5  ;;  %1507 = vmatpush3.bf16.msra.mxu1 %v1586_v5 }
  0x6a   : > { %1425 = vmatprep.subr.bf16.mxu0 %v1587_v6  ;;  %1500 = vmatprep.subr.bf16.mxu1 %v1587_v6 }
  0x6d   : > { %1426 = vmatpush3.bf16.msra.mxu0 %v1587_v6  ;;  %1508 = vmatpush3.bf16.msra.mxu1 %v1587_v6 }
  0x6e   : > { %1427 = vmatprep.subr.bf16.mxu0 %v1588_v7  ;;  %1501 = vmatprep.subr.bf16.mxu1 %v1588_v7 }
  0x71   : > { %1428 = vmatpush3.bf16.msra.mxu0 %v1588_v7  ;;  %1509 = vmatpush3.bf16.msra.mxu1 %v1588_v7 }
  0x72   : > { %1429 = vmatprep.subr.bf16.mxu0 %v1589_v8  ;;  %1502 = vmatprep.subr.bf16.mxu1 %v1589_v8 }
  0x75   : > { %1430 = vmatpush3.bf16.msra.mxu0 %v1589_v8  ;;  %1510 = vmatpush3.bf16.msra.mxu1 %v1589_v8 }
  0x78   : > { %1432 = vmatmul.mubr.bf16.vlgmr.msra.gmra.mrb[0].mxu0 %v1591_v10  ;;  %1464 = vmatmul.mubr.bf16.vlgmr.msra.gmra.mrb[0].mxu1 %v1607_v12 }
  0x79   : > { %1435 = vmatprep.mubr.bf16.mxu0 %v1592_v11  ;;  %1467 = vmatprep.mubr.bf16.mxu1 %v1608_v13 }
  0x80   : > { %1436 = vmatmul.mubr.bf16.gmra.mrb[4].mxu0 %v1593_v14  ;;  %1468 = vmatmul.mubr.bf16.gmra.mrb[4].mxu1 %v1609_v16 }
  0x81   : > { %1439 = vmatprep.mubr.bf16.mxu0 %v1594_v15  ;;  %1471 = vmatprep.mubr.bf16.mxu1 %v1610_v17 }
  0x88   : > { %1440 = vmatmul.mubr.bf16.gmra.mrb[8].mxu0 %v1595_v18  ;;  %1472 = vmatmul.mubr.bf16.gmra.mrb[8].mxu1 %v1611_v19 }
  0x89   : > { %1443 = vmatprep.mubr.bf16.mxu0 %v1596_v20  ;;  %1475 = vmatprep.mubr.bf16.mxu1 %v1612_v21 }
  0x90   : > { %1444 = vmatmul.mubr.bf16.gmra.mrb[12].mxu0 %v1597_v22  ;;  %1476 = vmatmul.mubr.bf16.gmra.mrb[12].mxu1 %v1613_v23 }
  0x91   : > { %1447 = vmatprep.mubr.bf16.mxu0 %v1598_v24  ;;  %1479 = vmatprep.mubr.bf16.mxu1 %v1614_v25 }
  0x98   : > { %1448 = vmatmul.mubr.bf16.gmra.mrb[16].mxu0 %v1599_v26  ;;  %1480 = vmatmul.mubr.bf16.gmra.mrb[16].mxu1 %v1615_v27 }
  0x99   : > { %1451 = vmatprep.mubr.bf16.mxu0 %v1600_v28  ;;  %1483 = vmatprep.mubr.bf16.mxu1 %v1616_v29 }
  0xa0   : > { %1452 = vmatmul.mubr.bf16.gmra.mrb[20].mxu0 %v1601_v30  ;;  %1484 = vmatmul.mubr.bf16.gmra.mrb[20].mxu1 %v1617_v31 }
  0xa1   : > { %1455 = vmatprep.mubr.bf16.mxu0 %v1602_v32  ;;  %1487 = vmatprep.mubr.bf16.mxu1 %v1618_v33 }
  0xa8   : > { %1456 = vmatmul.mubr.bf16.gmra.mrb[24].mxu0 %v1603_v34  ;;  %1488 = vmatmul.mubr.bf16.gmra.mrb[24].mxu1 %v1619_v35 }
  0xa9   : > { %1459 = vmatprep.mubr.bf16.mxu0 %v1604_v36  ;;  %1491 = vmatprep.mubr.bf16.mxu1 %v1620_v37 }
  0xb0   : > { %1460 = vmatmul.mubr.bf16.gmra.mrb[28].mxu0 %v1605_v38  ;;  %1492 = vmatmul.mubr.bf16.gmra.mrb[28].mxu1 %v1621_v39 }
 0x14b   : > { %v1433_v40 = vpop.f32.mrb[0].mxu0  ;;  %v2040_v41 = vpop.f32.mrb[0].mxu1 }
 0x14c   : > { %863 = vst [vmem:[%s2042_s23 + $0x10] sm:$0xff] %v1433_v40  ;;  %v606_v42 = vpop.f32.mrb[1].mxu0  ;;  %895 = vst [vmem:[%s2042_s23 + $0x110] sm:$0xff] %v2040_v41  ;;  %v2047_v43 = vpop.f32.mrb[1].mxu1  ;;  %v991_v51 = vmul.f32 %v1433_v40, %v1433_v40 }
 0x14d   : > { %861 = vst [vmem:[%s2042_s23] sm:$0xff] %v606_v42  ;;  %v1434_v44 = vpop.f32.mrb[2].mxu0  ;;  %893 = vst [vmem:[%s2042_s23 + $0x100] sm:$0xff] %v2047_v43  ;;  %v2052_v45 = vpop.f32.mrb[2].mxu1  ;;  %v989_v48 = vmul.f32 %v606_v42, %v606_v42 }
 0x14e   : > { %864 = vst [vmem:[%s2042_s23 + $0x18] sm:$0xff] %v1434_v44  ;;  %v609_v46 = vpop.f32.mrb[3].mxu0  ;;  %896 = vst [vmem:[%s2042_s23 + $0x118] sm:$0xff] %v2052_v45  ;;  %v2057_v47 = vpop.f32.mrb[3].mxu1  ;;  %v992_v54 = vmul.f32 %v1434_v44, %v1434_v44 }
 0x14f   : > { %862 = vst [vmem:[%s2042_s23 + $0x8] sm:$0xff] %v609_v46  ;;  %v925_v49 = vadd.f32 %v609_v46, %v606_v42  ;;  %v990_v50 = vmul.f32 %v609_v46, %v609_v46  ;;  %894 = vst [vmem:[%s2042_s23 + $0x108] sm:$0xff] %v2057_v47 }
 0x151   : > { %v926_v52 = vadd.f32 %v1433_v40, %v925_v49  ;;  %v1053_v53 = vadd.f32 %v990_v50, %v989_v48 }
 0x153   : > { %v1054_v55 = vadd.f32 %v1053_v53, %v991_v51  ;;  %v1437_v56 = vpop.f32.mrb[4].mxu0  ;;  %v927_v57 = vadd.f32 %v1434_v44, %v926_v52  ;;  %v2062_v58 = vpop.f32.mrb[4].mxu1 }
 0x154   : > { %867 = vst [vmem:[%s2042_s23 + $0x30] sm:$0xff] %v1437_v56  ;;  %v622_v59 = vpop.f32.mrb[5].mxu0  ;;  %899 = vst [vmem:[%s2042_s23 + $0x130] sm:$0xff] %v2062_v58  ;;  %v2067_v60 = vpop.f32.mrb[5].mxu1  ;;  %v995_v7 = vmul.f32 %v1437_v56, %v1437_v56 }
 0x155   : > { %865 = vst [vmem:[%s2042_s23 + $0x20] sm:$0xff] %v622_v59  ;;  %v928_v61 = vadd.f32 %v927_v57, %v622_v59  ;;  %v993_v62 = vmul.f32 %v622_v59, %v622_v59  ;;  %v1055_v63 = vadd.f32 %v1054_v55, %v992_v54  ;;  %v1438_v0 = vpop.f32.mrb[6].mxu0  ;;  %897 = vst [vmem:[%s2042_s23 + $0x120] sm:$0xff] %v2067_v60  ;;  %v2072_v1 = vpop.f32.mrb[6].mxu1 }
 0x156   : > { %868 = vst [vmem:[%s2042_s23 + $0x38] sm:$0xff] %v1438_v0  ;;  %v625_v2 = vpop.f32.mrb[7].mxu0  ;;  %900 = vst [vmem:[%s2042_s23 + $0x138] sm:$0xff] %v2072_v1  ;;  %v2077_v3 = vpop.f32.mrb[7].mxu1  ;;  %v996_v10 = vmul.f32 %v1438_v0, %v1438_v0 }
 0x157   : > { %v1056_v4 = vadd.f32 %v1055_v63, %v993_v62  ;;  %866 = vst [vmem:[%s2042_s23 + $0x28] sm:$0xff] %v625_v2  ;;  %v929_v5 = vadd.f32 %v928_v61, %v625_v2  ;;  %v994_v6 = vmul.f32 %v625_v2, %v625_v2  ;;  %898 = vst [vmem:[%s2042_s23 + $0x128] sm:$0xff] %v2077_v3 }
 0x159   : > { %v930_v8 = vadd.f32 %v1437_v56, %v929_v5  ;;  %v1057_v9 = vadd.f32 %v1056_v4, %v994_v6 }
 0x15b   : > { %v1058_v11 = vadd.f32 %v1057_v9, %v995_v7  ;;  %v1441_v12 = vpop.f32.mrb[8].mxu0  ;;  %v931_v13 = vadd.f32 %v1438_v0, %v930_v8  ;;  %v2082_v14 = vpop.f32.mrb[8].mxu1 }
 0x15c   : > { %871 = vst [vmem:[%s2042_s23 + $0x50] sm:$0xff] %v1441_v12  ;;  %v638_v15 = vpop.f32.mrb[9].mxu0  ;;  %903 = vst [vmem:[%s2042_s23 + $0x150] sm:$0xff] %v2082_v14  ;;  %v2087_v16 = vpop.f32.mrb[9].mxu1  ;;  %v999_v27 = vmul.f32 %v1441_v12, %v1441_v12 }
 0x15d   : > { %869 = vst [vmem:[%s2042_s23 + $0x40] sm:$0xff] %v638_v15  ;;  %v932_v17 = vadd.f32 %v931_v13, %v638_v15  ;;  %v997_v18 = vmul.f32 %v638_v15, %v638_v15  ;;  %v1059_v19 = vadd.f32 %v1058_v11, %v996_v10  ;;  %v1442_v20 = vpop.f32.mrb[10].mxu0  ;;  %901 = vst [vmem:[%s2042_s23 + $0x140] sm:$0xff] %v2087_v16  ;;  %v2092_v21 = vpop.f32.mrb[10].mxu1 }
 0x15e   : > { %872 = vst [vmem:[%s2042_s23 + $0x58] sm:$0xff] %v1442_v20  ;;  %v641_v22 = vpop.f32.mrb[11].mxu0  ;;  %904 = vst [vmem:[%s2042_s23 + $0x158] sm:$0xff] %v2092_v21  ;;  %v2097_v23 = vpop.f32.mrb[11].mxu1  ;;  %v1000_v30 = vmul.f32 %v1442_v20, %v1442_v20 }
 0x15f   : > { %v1060_v24 = vadd.f32 %v1059_v19, %v997_v18  ;;  %870 = vst [vmem:[%s2042_s23 + $0x48] sm:$0xff] %v641_v22  ;;  %v933_v25 = vadd.f32 %v932_v17, %v641_v22  ;;  %v998_v26 = vmul.f32 %v641_v22, %v641_v22  ;;  %902 = vst [vmem:[%s2042_s23 + $0x148] sm:$0xff] %v2097_v23 }
 0x161   : > { %v934_v28 = vadd.f32 %v1441_v12, %v933_v25  ;;  %v1061_v29 = vadd.f32 %v1060_v24, %v998_v26 }
 0x163   : > { %v1062_v31 = vadd.f32 %v1061_v29, %v999_v27  ;;  %v1445_v32 = vpop.f32.mrb[12].mxu0  ;;  %v935_v33 = vadd.f32 %v1442_v20, %v934_v28  ;;  %v2102_v34 = vpop.f32.mrb[12].mxu1 }
 0x164   : > { %875 = vst [vmem:[%s2042_s23 + $0x70] sm:$0xff] %v1445_v32  ;;  %v654_v35 = vpop.f32.mrb[13].mxu0  ;;  %907 = vst [vmem:[%s2042_s23 + $0x170] sm:$0xff] %v2102_v34  ;;  %v2107_v36 = vpop.f32.mrb[13].mxu1  ;;  %v1003_v51 = vmul.f32 %v1445_v32, %v1445_v32 }
 0x165   : > { %873 = vst [vmem:[%s2042_s23 + $0x60] sm:$0xff] %v654_v35  ;;  %v936_v37 = vadd.f32 %v935_v33, %v654_v35  ;;  %v1001_v38 = vmul.f32 %v654_v35, %v654_v35  ;;  %v1063_v39 = vadd.f32 %v1062_v31, %v1000_v30  ;;  %v1446_v40 = vpop.f32.mrb[14].mxu0  ;;  %905 = vst [vmem:[%s2042_s23 + $0x160] sm:$0xff] %v2107_v36  ;;  %v2112_v42 = vpop.f32.mrb[14].mxu1 }
 0x166   : > { %876 = vst [vmem:[%s2042_s23 + $0x78] sm:$0xff] %v1446_v40  ;;  %v657_v44 = vpop.f32.mrb[15].mxu0  ;;  %908 = vst [vmem:[%s2042_s23 + $0x178] sm:$0xff] %v2112_v42  ;;  %v2117_v46 = vpop.f32.mrb[15].mxu1  ;;  %v1004_v54 = vmul.f32 %v1446_v40, %v1446_v40 }
 0x167   : > { %v1064_v48 = vadd.f32 %v1063_v39, %v1001_v38  ;;  %874 = vst [vmem:[%s2042_s23 + $0x68] sm:$0xff] %v657_v44  ;;  %v937_v49 = vadd.f32 %v936_v37, %v657_v44  ;;  %v1002_v50 = vmul.f32 %v657_v44, %v657_v44  ;;  %906 = vst [vmem:[%s2042_s23 + $0x168] sm:$0xff] %v2117_v46 }
 0x169   : > { %v938_v52 = vadd.f32 %v1445_v32, %v937_v49  ;;  %v1065_v53 = vadd.f32 %v1064_v48, %v1002_v50 }
 0x16b   : > { %v1066_v55 = vadd.f32 %v1065_v53, %v1003_v51  ;;  %v1449_v56 = vpop.f32.mrb[16].mxu0  ;;  %v939_v57 = vadd.f32 %v1446_v40, %v938_v52  ;;  %v2122_v59 = vpop.f32.mrb[16].mxu1 }
 0x16c   : > { %879 = vst [vmem:[%s2042_s23 + $0x90] sm:$0xff] %v1449_v56  ;;  %v670_v61 = vpop.f32.mrb[17].mxu0  ;;  %911 = vst [vmem:[%s2042_s23 + $0x190] sm:$0xff] %v2122_v59  ;;  %v2127_v62 = vpop.f32.mrb[17].mxu1  ;;  %v1007_v11 = vmul.f32 %v1449_v56, %v1449_v56 }
 0x16d   : > { %877 = vst [vmem:[%s2042_s23 + $0x80] sm:$0xff] %v670_v61  ;;  %v940_v63 = vadd.f32 %v939_v57, %v670_v61  ;;  %v1005_v0 = vmul.f32 %v670_v61, %v670_v61  ;;  %v1067_v2 = vadd.f32 %v1066_v55, %v1004_v54  ;;  %v1450_v4 = vpop.f32.mrb[18].mxu0  ;;  %909 = vst [vmem:[%s2042_s23 + $0x180] sm:$0xff] %v2127_v62  ;;  %v2132_v5 = vpop.f32.mrb[18].mxu1 }
 0x16e   : > { %880 = vst [vmem:[%s2042_s23 + $0x98] sm:$0xff] %v1450_v4  ;;  %v673_v6 = vpop.f32.mrb[19].mxu0  ;;  %912 = vst [vmem:[%s2042_s23 + $0x198] sm:$0xff] %v2132_v5  ;;  %v2137_v7 = vpop.f32.mrb[19].mxu1  ;;  %v1008_v15 = vmul.f32 %v1450_v4, %v1450_v4 }
 0x16f   : > { %v1068_v8 = vadd.f32 %v1067_v2, %v1005_v0  ;;  %878 = vst [vmem:[%s2042_s23 + $0x88] sm:$0xff] %v673_v6  ;;  %v941_v9 = vadd.f32 %v940_v63, %v673_v6  ;;  %v1006_v10 = vmul.f32 %v673_v6, %v673_v6  ;;  %910 = vst [vmem:[%s2042_s23 + $0x188] sm:$0xff] %v2137_v7 }
 0x171   : > { %v942_v12 = vadd.f32 %v1449_v56, %v941_v9  ;;  %v1069_v13 = vadd.f32 %v1068_v8, %v1006_v10 }
 0x173   : > { %v1070_v17 = vadd.f32 %v1069_v13, %v1007_v11  ;;  %v1453_v18 = vpop.f32.mrb[20].mxu0  ;;  %v943_v19 = vadd.f32 %v1450_v4, %v942_v12  ;;  %v2142_v20 = vpop.f32.mrb[20].mxu1 }
 0x174   : > { %883 = vst [vmem:[%s2042_s23 + $0xb0] sm:$0xff] %v1453_v18  ;;  %v686_v22 = vpop.f32.mrb[21].mxu0  ;;  %915 = vst [vmem:[%s2042_s23 + $0x1b0] sm:$0xff] %v2142_v20  ;;  %v2147_v24 = vpop.f32.mrb[21].mxu1  ;;  %v1011_v37 = vmul.f32 %v1453_v18, %v1453_v18 }
 0x175   : > { %881 = vst [vmem:[%s2042_s23 + $0xa0] sm:$0xff] %v686_v22  ;;  %v944_v25 = vadd.f32 %v943_v19, %v686_v22  ;;  %v1009_v26 = vmul.f32 %v686_v22, %v686_v22  ;;  %v1071_v27 = vadd.f32 %v1070_v17, %v1008_v15  ;;  %v1454_v28 = vpop.f32.mrb[22].mxu0  ;;  %913 = vst [vmem:[%s2042_s23 + $0x1a0] sm:$0xff] %v2147_v24  ;;  %v2152_v29 = vpop.f32.mrb[22].mxu1 }
 0x176   : > { %884 = vst [vmem:[%s2042_s23 + $0xb8] sm:$0xff] %v1454_v28  ;;  %v689_v30 = vpop.f32.mrb[23].mxu0  ;;  %916 = vst [vmem:[%s2042_s23 + $0x1b8] sm:$0xff] %v2152_v29  ;;  %v2157_v31 = vpop.f32.mrb[23].mxu1  ;;  %v1012_v40 = vmul.f32 %v1454_v28, %v1454_v28 }
 0x177   : > { %v1072_v32 = vadd.f32 %v1071_v27, %v1009_v26  ;;  %882 = vst [vmem:[%s2042_s23 + $0xa8] sm:$0xff] %v689_v30  ;;  %v945_v33 = vadd.f32 %v944_v25, %v689_v30  ;;  %v1010_v35 = vmul.f32 %v689_v30, %v689_v30  ;;  %914 = vst [vmem:[%s2042_s23 + $0x1a8] sm:$0xff] %v2157_v31 }
 0x179   : > { %v946_v38 = vadd.f32 %v1453_v18, %v945_v33  ;;  %v1073_v39 = vadd.f32 %v1072_v32, %v1010_v35 }
 0x17b   : > { %v1074_v44 = vadd.f32 %v1073_v39, %v1011_v37  ;;  %v1457_v48 = vpop.f32.mrb[24].mxu0  ;;  %v947_v49 = vadd.f32 %v1454_v28, %v946_v38  ;;  %v2162_v50 = vpop.f32.mrb[24].mxu1 }
 0x17c   : > { %887 = vst [vmem:[%s2042_s23 + $0xd0] sm:$0xff] %v1457_v48  ;;  %v702_v51 = vpop.f32.mrb[25].mxu0  ;;  %919 = vst [vmem:[%s2042_s23 + $0x1d0] sm:$0xff] %v2162_v50  ;;  %v2167_v52 = vpop.f32.mrb[25].mxu1  ;;  %v1015_v6 = vmul.f32 %v1457_v48, %v1457_v48 }
 0x17d   : > { %885 = vst [vmem:[%s2042_s23 + $0xc0] sm:$0xff] %v702_v51  ;;  %v948_v53 = vadd.f32 %v947_v49, %v702_v51  ;;  %v1013_v54 = vmul.f32 %v702_v51, %v702_v51  ;;  %v1075_v55 = vadd.f32 %v1074_v44, %v1012_v40  ;;  %v1458_v56 = vpop.f32.mrb[26].mxu0  ;;  %917 = vst [vmem:[%s2042_s23 + $0x1c0] sm:$0xff] %v2167_v52  ;;  %v2172_v57 = vpop.f32.mrb[26].mxu1 }
 0x17e   : > { %888 = vst [vmem:[%s2042_s23 + $0xd8] sm:$0xff] %v1458_v56  ;;  %v705_v61 = vpop.f32.mrb[27].mxu0  ;;  %920 = vst [vmem:[%s2042_s23 + $0x1d8] sm:$0xff] %v2172_v57  ;;  %v2177_v63 = vpop.f32.mrb[27].mxu1  ;;  %v1016_v10 = vmul.f32 %v1458_v56, %v1458_v56 }
 0x17f   : > { %v1076_v0 = vadd.f32 %v1075_v55, %v1013_v54  ;;  %886 = vst [vmem:[%s2042_s23 + $0xc8] sm:$0xff] %v705_v61  ;;  %v949_v2 = vadd.f32 %v948_v53, %v705_v61  ;;  %v1014_v4 = vmul.f32 %v705_v61, %v705_v61  ;;  %918 = vst [vmem:[%s2042_s23 + $0x1c8] sm:$0xff] %v2177_v63 }
 0x181   : > { %v950_v8 = vadd.f32 %v1457_v48, %v949_v2  ;;  %v1077_v9 = vadd.f32 %v1076_v0, %v1014_v4 }
 0x183   : > { %v1078_v11 = vadd.f32 %v1077_v9, %v1015_v6  ;;  %v1461_v12 = vpop.f32.mrb[28].mxu0  ;;  %v951_v13 = vadd.f32 %v1458_v56, %v950_v8  ;;  %v2184_v15 = vpop.f32.mrb[28].mxu1 }
 0x184   : > { %891 = vst [vmem:[%s2042_s23 + $0xf0] sm:$0xff] %v1461_v12  ;;  %v718_v17 = vpop.f32.mrb[29].mxu0  ;;  %923 = vst [vmem:[%s2042_s23 + $0x1f0] sm:$0xff] %v2184_v15  ;;  %v2189_v18 = vpop.f32.mrb[29].mxu1 }
 0x185   : > { %889 = vst [vmem:[%s2042_s23 + $0xe0] sm:$0xff] %v718_v17  ;;  %v952_v19 = vadd.f32 %v951_v13, %v718_v17  ;;  %v1017_v22 = vmul.f32 %v718_v17, %v718_v17  ;;  %v1079_v25 = vadd.f32 %v1078_v11, %v1016_v10  ;;  %v1462_v26 = vpop.f32.mrb[30].mxu0  ;;  %921 = vst [vmem:[%s2042_s23 + $0x1e0] sm:$0xff] %v2189_v18  ;;  %v2201_v27 = vpop.f32.mrb[30].mxu1 }
 0x186   : > { %892 = vst [vmem:[%s2042_s23 + $0xf8] sm:$0xff] %v1462_v26  ;;  %v721_v28 = vpop.f32.mrb[31].mxu0  ;;  %924 = vst [vmem:[%s2042_s23 + $0x1f8] sm:$0xff] %v2201_v27  ;;  %v2206_v30 = vpop.f32.mrb[31].mxu1 }
 0x187   : > { %v1080_v32 = vadd.f32 %v1079_v25, %v1017_v22  ;;  %890 = vst [vmem:[%s2042_s23 + $0xe8] sm:$0xff] %v721_v28  ;;  %v953_v33 = vadd.f32 %v952_v19, %v721_v28  ;;  %v1018_v35 = vmul.f32 %v721_v28, %v721_v28  ;;  %922 = vst [vmem:[%s2042_s23 + $0x1e8] sm:$0xff] %v2206_v30 }
 0x188   : > { %1693 = shalt.err (!%p1690_p7)
}
 0x189   : > { %s1694_s7 = scalar_lea.hbm %s2194_s29, 8192  ;;  %s1698_s21 = scalar_lea.hbm %s2420_s2, 16384 }
 0x18a   : > { %p1695_p9 = scmp.ne.s32.totalorder %s2194_s29, %s1694_s7  ;;  %p1699_p5 = scmp.lt.u32.totalorder %s2194_s29, %s2420_s2 }
 0x18b   : > { %p1700_p11 = scmp.lt.u32.totalorder %s1698_s21, %s1694_s7  ;;  %p1702_p4 = scmp.lt.u32.totalorder %s1694_s7, %s2194_s29 }
 0x18c   : > { %p1696_p1 = pnand %p1695_p9, %p1942_p12 }
 0x18d   : > { %p1701_p2 = por %p1700_p11, %p1699_p5 }
 0x18e   : > { %p1697_p0 = pneg %p1696_p1 }
 0x18f   : > { %p1703_p6 = por %p1702_p4, %p1701_p2 }
 0x191   : > { %p1704_p8 = pnand %p1703_p6, %p1697_p0 }
 0x193   : > { %1707 = shalt.err (!%p1704_p8)
}
 0x194   : > { %s1817_s10 = smov 128   ;;  %s1818_s28 = smov 8   ;;  %v1019_v37 = vmul.f32 %v1461_v12, %v1461_v12  ;;  %v954_v38 = vadd.f32 %v1461_v12, %v953_v33  ;;  %v1081_v39 = vadd.f32 %v1080_v32, %v1018_v35  ;;  %v1020_v40 = vmul.f32 %v1462_v26, %v1462_v26 }
 0x195   : > { %1517 = dma.vmem_to_hbm [thread:$0]  (%p1942_p12), %s2196_s13, 8192, %s2194_s29, %s1118_s11, %s1817_s10, %s1817_s10, %s1818_s28   ;;  %v1021_v49 = vmul.f32 %v2047_v43, %v2047_v43  ;;  %v1022_v56 = vmul.f32 %v2057_v47, %v2057_v47  ;;  %v1023_v61 = vmul.f32 %v2040_v41, %v2040_v41  ;;  %v1024_v4 = vmul.f32 %v2052_v45, %v2052_v45 }
 0x196   : > { %v1082_v44 = vadd.f32 %v1081_v39, %v1019_v37  ;;  %v955_v48 = vadd.f32 %v1462_v26, %v954_v38  ;;  %v1026_v12 = vmul.f32 %v2077_v3, %v2077_v3  ;;  %v1030_v32 = vmul.f32 %v2097_v23, %v2097_v23  ;;  %s1322_s13 = sshll.u32 %s1993_s14, 3  ;;  %s1122_s29 = sand.u32 1, %s1867_s19  }
 0x197   : > { %s1369_s14 = sshll.u32 %s1867_s19, 7  ;;  %s241_s11 = scalar_lea.vmem [#allocation8], %s1322_s13 }
 0x198   : > { %v956_v51 = vadd.f32 %v955_v48, %v2047_v43  ;;  %v1083_v53 = vadd.f32 %v1082_v44, %v1020_v40  ;;  %v1025_v43 = vmul.f32 %v2067_v60, %v2067_v60  ;;  %v1034_v48 = vmul.f32 %v2117_v46, %v2117_v46  ;;  %s1157_s26 = sshll.u32 %s241_s11, 4  ;;  %s2331_s25 = scalar_lea.vmem [#allocation10], %s1322_s13  ;;  %s2342_s26 = int_to_ptr.vmem [resolvable:$true] %s1157_s26 }
 0x199   : > { %s1170_s24 = sshll.u32 %s2331_s25, 4  ;;  %s2340_s7 = scalar_lea.hbm %s2421_s3, %s1369_s14  ;;  %s2349_s24 = int_to_ptr.vmem [resolvable:$true] %s1170_s24 }
 0x19a   : > { %v1084_v54 = vadd.f32 %v1083_v53, %v1021_v49  ;;  %v957_v55 = vadd.f32 %v956_v51, %v2057_v47  ;;  %s2347_s21 = scalar_lea.hbm %s2422_s4, %s1369_s14  ;;  %s2351_s23 = scalar_lea.sflag [#allocation9], %s1122_s29 }
 0x19b   : > { %s1708_s12 = scalar_lea.vmem %s2342_s26, 128  ;;  %s1819_s10 = smov [#allocation8]  }
 0x19c   : > { %v958_v0 = vadd.f32 %v2040_v41, %v957_v55  ;;  %v1085_v2 = vadd.f32 %v1084_v54, %v1022_v56  ;;  %v1027_v41 = vmul.f32 %v2062_v58, %v2062_v58  ;;  %p1709_p10 = scmp.ne.s32.totalorder %s2342_s26, %s1708_s12  ;;  %s1712_s28 = sshll.u32 %s1819_s10, 4  ;;  %s1713_s28 = int_to_ptr.vmem [resolvable:$false] %s1712_s28 }
 0x19d   : > { %s1714_s13 = scalar_lea.vmem %s1713_s28, 256  ;;  %p1715_p7 = scmp.lt.s32.totalorder %s2342_s26, %s1713_s28 }
 0x19e   : > { %v1086_v6 = vadd.f32 %v1085_v2, %v1023_v61  ;;  %v959_v8 = vadd.f32 %v2052_v45, %v958_v0  ;;  %v1028_v45 = vmul.f32 %v2072_v1, %v2072_v1  ;;  %v1038_v0 = vmul.f32 %v2137_v7, %v2137_v7  ;;  %p1710_p13 = pnand %p1709_p10, %p1942_p12  ;;  %p1716_p9 = scmp.lt.s32.totalorder %s1714_s13, %s1708_s12 }
 0x1a0   : > { %v960_v9 = vadd.f32 %v959_v8, %v2067_v60  ;;  %v1087_v10 = vadd.f32 %v1086_v6, %v1024_v4  ;;  %v1029_v60 = vmul.f32 %v2087_v16, %v2087_v16  ;;  %p1711_p3 = pneg %p1710_p13  ;;  %p1717_p1 = por %p1716_p9, %p1715_p7 }
 0x1a2   : > { %v1088_v11 = vadd.f32 %v1087_v10, %v1025_v43  ;;  %v961_v47 = vadd.f32 %v960_v9, %v2077_v3  ;;  %p1718_p0 = pnand %p1717_p1, %p1711_p3 }
 0x1a4   : > { %v962_v13 = vadd.f32 %v2062_v58, %v961_v47  ;;  %v1089_v17 = vadd.f32 %v1088_v11, %v1026_v12  ;;  %v1031_v58 = vmul.f32 %v2082_v14, %v2082_v14  ;;  %v1042_v11 = vmul.f32 %v2157_v31, %v2157_v31 }
 0x1a6   : > { %v1090_v19 = vadd.f32 %v1089_v17, %v1027_v41  ;;  %v963_v22 = vadd.f32 %v2072_v1, %v962_v13  ;;  %v1032_v1 = vmul.f32 %v2092_v21, %v2092_v21  ;;  %v1045_v13 = vmul.f32 %v2167_v52, %v2167_v52 }
 0x1a8   : > { %v964_v25 = vadd.f32 %v963_v22, %v2087_v16  ;;  %v1091_v26 = vadd.f32 %v1090_v19, %v1028_v45  ;;  %v1033_v16 = vmul.f32 %v2107_v36, %v2107_v36  ;;  %v1047_v22 = vmul.f32 %v2162_v50, %v2162_v50 }
 0x1aa   : > { %v1092_v28 = vadd.f32 %v1091_v26, %v1029_v60  ;;  %v965_v3 = vadd.f32 %v964_v25, %v2097_v23  ;;  %v1048_v25 = vmul.f32 %v2172_v57, %v2172_v57 }
 0x1ac   : > { %v966_v33 = vadd.f32 %v2082_v14, %v965_v3  ;;  %v1093_v35 = vadd.f32 %v1092_v28, %v1030_v32  ;;  %v1035_v14 = vmul.f32 %v2102_v34, %v2102_v34  ;;  %v1049_v28 = vmul.f32 %v2189_v18, %v2189_v18 }
 0x1ae   : > { %v1094_v37 = vadd.f32 %v1093_v35, %v1031_v58  ;;  %v967_v38 = vadd.f32 %v2092_v21, %v966_v33  ;;  %v1036_v21 = vmul.f32 %v2112_v42, %v2112_v42  ;;  %v1051_v33 = vmul.f32 %v2184_v15, %v2184_v15 }
 0x1b0   : > { %v968_v39 = vadd.f32 %v967_v38, %v2107_v36  ;;  %v1095_v40 = vadd.f32 %v1094_v37, %v1032_v1  ;;  %v1037_v36 = vmul.f32 %v2127_v62, %v2127_v62 }
 0x1b2   : > { %v1096_v44 = vadd.f32 %v1095_v40, %v1033_v16  ;;  %v969_v23 = vadd.f32 %v968_v39, %v2117_v46 }
 0x1b4   : > { %v970_v49 = vadd.f32 %v2102_v34, %v969_v23  ;;  %v1097_v51 = vadd.f32 %v1096_v44, %v1034_v48  ;;  %v1039_v34 = vmul.f32 %v2122_v59, %v2122_v59 }
 0x1b6   : > { %v1098_v53 = vadd.f32 %v1097_v51, %v1035_v14  ;;  %v971_v54 = vadd.f32 %v2112_v42, %v970_v49  ;;  %v1040_v42 = vmul.f32 %v2132_v5, %v2132_v5 }
 0x1b8   : > { %v972_v55 = vadd.f32 %v971_v54, %v2127_v62  ;;  %v1099_v56 = vadd.f32 %v1098_v53, %v1036_v21  ;;  %v1041_v62 = vmul.f32 %v2147_v24, %v2147_v24 }
 0x1ba   : > { %v1100_v61 = vadd.f32 %v1099_v56, %v1037_v36  ;;  %v973_v46 = vadd.f32 %v972_v55, %v2137_v7 }
 0x1bc   : > { %v974_v2 = vadd.f32 %v2122_v59, %v973_v46  ;;  %v1101_v4 = vadd.f32 %v1100_v61, %v1038_v0  ;;  %v1043_v59 = vmul.f32 %v2142_v20, %v2142_v20 }
 0x1be   : > { %v1102_v6 = vadd.f32 %v1101_v4, %v1039_v34  ;;  %v975_v8 = vadd.f32 %v2132_v5, %v974_v2  ;;  %v1044_v5 = vmul.f32 %v2152_v29, %v2152_v29 }
 0x1c0   : > { %v976_v43 = vadd.f32 %v975_v8, %v2147_v24  ;;  %v1103_v9 = vadd.f32 %v1102_v6, %v1040_v42 }
 0x1c2   : > { %v1104_v10 = vadd.f32 %v1103_v9, %v1041_v62  ;;  %v977_v7 = vadd.f32 %v976_v43, %v2157_v31 }
 0x1c4   : > { %v978_v47 = vadd.f32 %v2142_v20, %v977_v7  ;;  %v1105_v12 = vadd.f32 %v1104_v10, %v1042_v11  ;;  %v1046_v20 = vmul.f32 %v2177_v63, %v2177_v63 }
 0x1c6   : > { %v1106_v41 = vadd.f32 %v1105_v12, %v1043_v59  ;;  %v979_v24 = vadd.f32 %v2152_v29, %v978_v47 }
 0x1c8   : > { %v980_v17 = vadd.f32 %v979_v24, %v2167_v52  ;;  %v1107_v45 = vadd.f32 %v1106_v41, %v1044_v5 }
 0x1ca   : > { %v1108_v31 = vadd.f32 %v1107_v45, %v1045_v13  ;;  %v981_v19 = vadd.f32 %v980_v17, %v2177_v63 }
 0x1cc   : > { %v982_v60 = vadd.f32 %v2162_v50, %v981_v19  ;;  %v1109_v29 = vadd.f32 %v1108_v31, %v1046_v20  ;;  %v1050_v50 = vmul.f32 %v2206_v30, %v2206_v30 }
 0x1ce   : > { %v1110_v52 = vadd.f32 %v1109_v29, %v1047_v22  ;;  %v983_v26 = vadd.f32 %v2172_v57, %v982_v60 }
 0x1d0   : > { %v984_v3 = vadd.f32 %v983_v26, %v2189_v18  ;;  %v1111_v32 = vadd.f32 %v1110_v52, %v1048_v25  ;;  %v1052_v18 = vmul.f32 %v2201_v27, %v2201_v27 }
 0x1d2   : > { %v1112_v63 = vadd.f32 %v1111_v32, %v1049_v28  ;;  %v985_v58 = vadd.f32 %v984_v3, %v2206_v30 }
 0x1d4   : > { %v986_v57 = vadd.f32 %v2184_v15, %v985_v58  ;;  %v1113_v35 = vadd.f32 %v1112_v63, %v1050_v50 }
 0x1d6   : > { %v987_v30 = vadd.f32 %v2201_v27, %v986_v57  ;;  %v1114_v1 = vadd.f32 %v1113_v35, %v1051_v33 }
 0x1d8   : > { %v1115_v15 = vadd.f32 %v1114_v1, %v1052_v18  ;;  %988 = vst [vmem:[%s241_s11] sm:$0xff] %v987_v30 }
 0x1d9   : > { %1721 = shalt.err (!%p1718_p0)
}
 0x1da   : > { %s1722_s29 = scalar_lea.hbm %s2340_s7, 128  ;;  %s1726_s19 = scalar_lea.hbm %s2421_s3, 256 }
 0x1db   : > { %p1723_p5 = scmp.ne.s32.totalorder %s2340_s7, %s1722_s29  ;;  %p1727_p4 = scmp.lt.u32.totalorder %s2340_s7, %s2421_s3 }
 0x1dc   : > { %p1728_p6 = scmp.lt.u32.totalorder %s1726_s19, %s1722_s29  ;;  %p1730_p10 = scmp.lt.u32.totalorder %s1722_s29, %s2340_s7 }
 0x1dd   : > { %p1724_p11 = pnand %p1723_p5, %p1942_p12 }
 0x1de   : > { %p1729_p8 = por %p1728_p6, %p1727_p4 }
 0x1df   : > { %p1725_p2 = pneg %p1724_p11 }
 0x1e0   : > { %p1731_p13 = por %p1730_p10, %p1729_p8 }
 0x1e2   : > { %p1732_p3 = pnand %p1731_p13, %p1725_p2 }
 0x1e4   : > { %1735 = shalt.err (!%p1732_p3)
}
 0x1e5   : > { %1518 = dma.vmem_to_hbm [thread:$0]  (%p1942_p12), %s2342_s26, 128, %s2340_s7, %s2351_s23   ;;  %1116 = vst [vmem:[%s2331_s25] sm:$0xff] %v1115_v15 }
 0x1e6   : > { %s1736_s9 = scalar_lea.vmem %s2349_s24, 128  ;;  %s1820_s12 = smov [#allocation10]  }
 0x1e7   : > { %p1737_p7 = scmp.ne.s32.totalorder %s2349_s24, %s1736_s9  ;;  %s1740_s10 = sshll.u32 %s1820_s12, 4  ;;  %s1741_s10 = int_to_ptr.vmem [resolvable:$false] %s1740_s10 }
 0x1e8   : > { %s1742_s28 = scalar_lea.vmem %s1741_s10, 256  ;;  %p1743_p0 = scmp.lt.s32.totalorder %s2349_s24, %s1741_s10 }
 0x1e9   : > { %p1738_p9 = pnand %p1737_p7, %p1942_p12  ;;  %p1744_p5 = scmp.lt.s32.totalorder %s1742_s28, %s1736_s9 }
 0x1eb   : > { %p1739_p1 = pneg %p1738_p9  ;;  %p1745_p11 = por %p1744_p5, %p1743_p0 }
 0x1ed   : > { %p1746_p2 = pnand %p1745_p11, %p1739_p1 }
 0x1ef   : > { %1749 = shalt.err (!%p1746_p2)
}
 0x1f0   : > { %s1750_s26 = scalar_lea.hbm %s2347_s21, 128  ;;  %s1754_s13 = scalar_lea.hbm %s2422_s4, 256 }
 0x1f1   : > { %p1751_p4 = scmp.ne.s32.totalorder %s2347_s21, %s1750_s26  ;;  %p1755_p10 = scmp.lt.u32.totalorder %s2347_s21, %s2422_s4 }
 0x1f2   : > { %p1756_p13 = scmp.lt.u32.totalorder %s1754_s13, %s1750_s26  ;;  %p1758_p7 = scmp.lt.u32.totalorder %s1750_s26, %s2347_s21 }
 0x1f3   : > { %p1752_p6 = pnand %p1751_p4, %p1942_p12 }
 0x1f4   : > { %p1757_p3 = por %p1756_p13, %p1755_p10 }
 0x1f5   : > { %p1753_p8 = pneg %p1752_p6 }
 0x1f6   : > { %p1759_p9 = por %p1758_p7, %p1757_p3 }
 0x1f8   : > { %p1760_p1 = pnand %p1759_p9, %p1753_p8 }
 0x1fa   : > { %1763 = shalt.err (!%p1760_p1)
}
 0x1fb   : > { %1519 = dma.vmem_to_hbm [thread:$0]  (%p1942_p12), %s2349_s24, 128, %s2347_s21, %s2351_s23  }
 0x1fc PF: > { %s1182_s11 = sand.u32 1, %s1798_s15   ;;  %p2437_p0 = scmp.ne.s32.totalorder %s2427_s22, 0 }
 0x1fd   : > { %p2438_p5 = scmp.ge.s32.totalorder %s1810_s18, 2  ;;  %s1183_s19 = scalar_lea.sflag [#allocation4], %s1182_s11 }
 0x1ff   : > { %p1532_p11 = pnand %p2438_p5, %p2437_p0 }
 0x201   : > { %1789 = dma.done.wait (!%p1532_p11), %s1183_s19, 8192  }
 0x202   : > { %1791 = vsyncadd (!%p1532_p11), %s1183_s19, 4294959104  ;;  %s1191_s6 = sand.u32 1, %s1311_s20  }
 0x203   : > { %s1192_s8 = scalar_lea.sflag [#allocation9], %s1191_s6 }
 0x204   : > { %1793 = dma.done.wait (!%p1532_p11), %s1192_s8, 256  }
 0x205   : > { %1795 = vsyncadd (!%p1532_p11), %s1192_s8, 4294967040  ;;  %p22_p12 = scmp.ge.s32.totalorder %s1904_s27, 4   ;;  %s2439_s15 = smov %s1802_s16 }
 0x206   : > { %s2440_s16 = smov %s1806_s17  ;;  %s2441_s17 = smov %s1938_s30 }
 0x207   : > { %s2442_s18 = smov %s1904_s27  ;;  %24 = sbr.rel (!%p22_p12) target bundleno = 8 (0x8), region = 109 }
 0x20e   :  { %1206 = vsyncpa [#allocation3], 1 }
 0x20f   :  { %1208 = vsyncpa [#allocation3 + $0x1], 1 }
 0x210   :  { %1209 = vsyncpa [#allocation6], 1 }
 0x211   :  { %1210 = vsyncpa [#allocation4], 1 }
 0x212   :  { %1212 = vsyncpa [#allocation4 + $0x1], 1 }
 0x213   :  { %1213 = vsyncpa [#allocation9], 1 }
 0x214   :  { %1215 = vsyncpa [#allocation9 + $0x1], 1 }

</bundles_post_ra>
